<compile_context>
chip_gen: v7x
topology: tpu7x:2x2x1
jax: 0.10.0
libtpu: 0.0.40
codegen_flags: <defaults>
</compile_context>

<pallas_src>
import functools
import math

import jax
import jax.numpy as jnp
from jax.experimental import pallas as pl
from jax.experimental.pallas import tpu as pltpu


def gcn_kernel(alpha_ref, x_ref, adj_ref, wcat_ref, o_ref,
               hpre_ref, acc_ref, *, tile, f_pad):
    # alpha_ref: (1,) f32 in SMEM        (PReLU slope)
    # x_ref:     (N_pad, in_ft) bf16     (whole batch element, resident per b)
    # adj_ref:   (tile, tile) bf16       (adjacency tile for (b, m, k))
    # wcat_ref:  (in_ft, 2*f_pad) bf16   ([Wfc | Wres], padded, resident)
    # o_ref:     (tile, f_pad) f32       (output row tile for (b, m))
    # hpre_ref:  VMEM (N_pad, 2*f_pad) bf16 scratch  (x @ Wcat, per batch)
    # acc_ref:   VMEM (tile, f_pad) f32 scratch      (adj @ h accumulator)
    m = pl.program_id(1)
    k = pl.program_id(2)
    nk = pl.num_programs(2)

    # Project x once per batch element (first grid step of this b).
    @pl.when((m == 0) & (k == 0))
    def _():
        hpre_ref[...] = jnp.dot(
            x_ref[...], wcat_ref[...],
            preferred_element_type=jnp.float32).astype(hpre_ref.dtype)

    # Start of the k-reduction for this output row tile.
    @pl.when(k == 0)
    def _():
        acc_ref[...] = jnp.zeros_like(acc_ref)

    # acc += adj[m-tile, k-tile] @ h_pre[k-tile, :f_pad]
    koff = pl.multiple_of(k * tile, tile)
    h_k = hpre_ref[pl.ds(koff, tile), :f_pad]
    acc_ref[...] += jnp.dot(adj_ref[...], h_k,
                            preferred_element_type=jnp.float32)

    # End of the reduction: residual blend + PReLU, lane-dense f32 store.
    @pl.when(k == nk - 1)
    def _():
        moff = pl.multiple_of(m * tile, tile)
        res = hpre_ref[pl.ds(moff, tile), f_pad:].astype(jnp.float32)
        s = 0.2 * res + 0.8 * acc_ref[...]
        alpha = alpha_ref[0]
        o_ref[...] = jnp.where(s > 0, s, alpha * s).astype(o_ref.dtype)


def gcn_layer(seq, adj, w_fc, w_res, prelu_alpha, *, tile=128):
    """seq: (B, N, in_ft), adj: (B, N, N), w_fc/w_res: (in_ft, out_ft)."""
    B, N, in_ft = seq.shape
    out_ft = w_fc.shape[1]

    # Pad N up to a tile multiple and out_ft up to 128 (lane-dense output).
    n_pad = pl.cdiv(N, tile) * tile
    f_pad = pl.cdiv(out_ft, 128) * 128

    # Fused weight: columns [0:out_ft] = Wfc, [f_pad:f_pad+out_ft] = Wres.
    w_cat = jnp.zeros((in_ft, 2 * f_pad), jnp.float32)
    w_cat = w_cat.at[:, :out_ft].set(w_fc.astype(jnp.float32))
    w_cat = w_cat.at[:, f_pad:f_pad + out_ft].set(w_res.astype(jnp.float32))
    w_cat = w_cat.astype(jnp.bfloat16)

    seq_p = jnp.pad(seq, ((0, 0), (0, n_pad - N), (0, 0))).astype(jnp.bfloat16)
    adj_p = jnp.pad(adj, ((0, 0), (0, n_pad - N), (0, n_pad - N))).astype(jnp.bfloat16)
    alpha = jnp.asarray(prelu_alpha, jnp.float32).reshape((1,))

    m_tiles = n_pad // tile
    k_tiles = n_pad // tile

    flops = 2 * B * n_pad * in_ft * (2 * f_pad) + 2 * B * n_pad * n_pad * f_pad
    bytes_accessed = (adj_p.size * 2 + seq_p.size * 2 + w_cat.size * 2
                      + B * n_pad * f_pad * 4)

    out = pl.pallas_call(
        functools.partial(gcn_kernel, tile=tile, f_pad=f_pad),
        out_shape=jax.ShapeDtypeStruct((B, n_pad, f_pad), seq.dtype),
        grid_spec=pltpu.PrefetchScalarGridSpec(
            num_scalar_prefetch=0,
            grid=(B, m_tiles, k_tiles),
            in_specs=[
                pl.BlockSpec(memory_space=pltpu.MemorySpace.SMEM),         # alpha
                pl.BlockSpec((None, n_pad, in_ft), lambda b, m, k: (b, 0, 0)),   # seq
                pl.BlockSpec((None, tile, tile), lambda b, m, k: (b, m, k)),     # adj
                pl.BlockSpec((in_ft, 2 * f_pad), lambda b, m, k: (0, 0)),        # w_cat
            ],
            out_specs=pl.BlockSpec((None, tile, f_pad), lambda b, m, k: (b, m, 0)),
            scratch_shapes=[
                pltpu.VMEM((n_pad, 2 * f_pad), jnp.bfloat16),   # h_pre = x @ Wcat
                pltpu.VMEM((tile, f_pad), jnp.float32),         # accumulator
            ],
        ),
        compiler_params=pltpu.CompilerParams(
            dimension_semantics=("parallel", "arbitrary", "arbitrary")),
        cost_estimate=pl.CostEstimate(
            flops=flops, transcendentals=0, bytes_accessed=bytes_accessed),
    )(alpha, seq_p, adj_p, w_cat)

    return out[:, :N, :out_ft]


def _xavier_uniform(key, shape, gain):
    # shape = (out_ft, in_ft) PyTorch convention; fan_in=in_ft, fan_out=out_ft
    fan_out, fan_in = shape
    bound = gain * math.sqrt(6.0 / (fan_in + fan_out))
    return jax.random.uniform(key, shape, jnp.float32, -bound, bound)


def _xavier_normal(key, shape, gain):
    fan_out, fan_in = shape
    std = gain * math.sqrt(2.0 / (fan_in + fan_out))
    return jax.random.normal(key, shape, jnp.float32) * std


if __name__ == "__main__":
    key = jax.random.PRNGKey(0)
    k_seq, k_adj, k_fc, k_res = jax.random.split(key, 4)

    # Small but tiling-exercising shapes: 2x2 adjacency tiles per batch element.
    B, N, in_ft, out_ft = 2, 256, 32, 32

    seq = jax.random.normal(k_seq, (B, N, in_ft), jnp.float32)
    # Simple symmetric row-normalized adjacency (dense).
    a = jax.random.uniform(k_adj, (B, N, N), jnp.float32)
    a = (a + jnp.transpose(a, (0, 2, 1))) * 0.5 + jnp.eye(N)[None]
    adj = a / jnp.sum(a, axis=-1, keepdims=True)

    # PyTorch Linear weights (out_ft, in_ft); pass transposed (in_ft, out_ft).
    w_fc_pt = _xavier_uniform(k_fc, (out_ft, in_ft), gain=1.414)
    w_res_pt = _xavier_normal(k_res, (out_ft, in_ft), gain=1.414)
    w_fc = w_fc_pt.T
    w_res = w_res_pt.T
    prelu_alpha = 0.25  # nn.PReLU() default init

    out = gcn_layer(seq, adj, w_fc, w_res, prelu_alpha, tile=128)
    jax.block_until_ready(out)

    # Pure-JAX reference with matching bf16-input / f32-accumulate semantics.
    f32 = jnp.float32
    seq_b = seq.astype(jnp.bfloat16).astype(f32)
    adj_b = adj.astype(jnp.bfloat16).astype(f32)
    wfc_b = w_fc.astype(jnp.bfloat16).astype(f32)
    wres_b = w_res.astype(jnp.bfloat16).astype(f32)
    h_pre = jnp.einsum("bnk,kf->bnf", seq_b, wfc_b).astype(jnp.bfloat16).astype(f32)
    res = jnp.einsum("bnk,kf->bnf", seq_b, wres_b).astype(jnp.bfloat16).astype(f32)
    h = jnp.einsum("bnm,bmf->bnf", adj_b, h_pre)
    s = 0.2 * res + 0.8 * h
    ref = jnp.where(s > 0, s, prelu_alpha * s)

    assert out.shape == (B, N, out_ft), f"bad shape {out.shape}"
    assert jnp.allclose(out, ref, atol=2e-2, rtol=2e-2), "mismatch vs reference"

    print("KERNEL_OK")
</pallas_src>

<mosaic_0001>
module attributes {stable_mosaic.version = 11 : i64} {
  func.func @gcn_kernel(%arg0: i32, %arg1: i32, %arg2: i32, %arg3: memref<1xf32, #tpu.memory_space<smem>>, %arg4: memref<1x256x32xbf16, #tpu.memory_space<vmem>>, %arg5: memref<1x128x128xbf16, #tpu.memory_space<vmem>>, %arg6: memref<32x256xbf16, #tpu.memory_space<vmem>>, %arg7: memref<1x128x128xf32, #tpu.memory_space<vmem>>, %arg8: memref<256x256xbf16, #tpu.memory_space<vmem>>, %arg9: memref<128x128xf32, #tpu.memory_space<vmem>>) attributes {dimension_semantics = [#tpu.dimension_semantics<parallel>, #tpu.dimension_semantics<arbitrary>, #tpu.dimension_semantics<arbitrary>], iteration_bounds = array<i64: 2, 2, 2>, scalar_prefetch = 0 : i64, scratch_operands = 2 : i64, tpu.core_type = #tpu.core_type<tc>, window_params = [{transform_indices = @transform_0, window_bounds = array<i64: 1>}, {transform_indices = @transform_1, window_bounds = array<i64: 1, 256, 32>}, {transform_indices = @transform_2, window_bounds = array<i64: 1, 128, 128>}, {pipeline_mode = #tpu.pipeline_mode<synchronous>, transform_indices = @transform_3, window_bounds = array<i64: 32, 256>}, {transform_indices = @transform_4, window_bounds = array<i64: 1, 128, 128>}]} {
    %c0_i32 = arith.constant 0 : i32
    %0 = arith.cmpi eq, %arg1, %c0_i32 : i32
    %c0_i32_0 = arith.constant 0 : i32
    %1 = arith.cmpi eq, %arg2, %c0_i32_0 : i32
    %2 = arith.andi %0, %1 : i1
    %3 = arith.extui %2 : i1 to i32
    %c0_i32_1 = arith.constant 0 : i32
    %4 = arith.cmpi ne, %3, %c0_i32_1 : i32
    scf.if %4 {
      %c0_12 = arith.constant 0 : index
      %c0_13 = arith.constant 0 : index
      %c0_14 = arith.constant 0 : index
      %21 = vector.load %arg4[%c0_12, %c0_13, %c0_14] : memref<1x256x32xbf16, #tpu.memory_space<vmem>>, vector<1x256x32xbf16>
      %22 = vector.shape_cast %21 : vector<1x256x32xbf16> to vector<256x32xbf16>
      %c0_15 = arith.constant 0 : index
      %c0_16 = arith.constant 0 : index
      %23 = vector.load %arg6[%c0_15, %c0_16] : memref<32x256xbf16, #tpu.memory_space<vmem>>, vector<32x256xbf16>
      %cst_17 = arith.constant dense<0.000000e+00> : vector<256x256xf32>
      %24 = tpu.matmul %22, %23, %cst_17 {dimension_numbers = #tpu.dot_dimension_numbers<[1], [0], [0], [1], [0, 0, 1, 1], [], []>} : vector<256x32xbf16>, vector<32x256xbf16>, vector<256x256xf32> -> vector<256x256xf32>
      %25 = arith.truncf %24 : vector<256x256xf32> to vector<256x256xbf16>
      %c0_18 = arith.constant 0 : index
      %c0_19 = arith.constant 0 : index
      %26 = vector.load %arg8[%c0_18, %c0_19] : memref<256x256xbf16, #tpu.memory_space<vmem>>, vector<256x256xbf16>
      tpu.vector_store %arg8[%c0_18, %c0_19], %25 {strides = array<i32>} : memref<256x256xbf16, #tpu.memory_space<vmem>>, vector<256x256xbf16>,
    } else {
    }
    %c0_i32_2 = arith.constant 0 : i32
    %5 = arith.cmpi eq, %arg2, %c0_i32_2 : i32
    %6 = arith.extui %5 : i1 to i32
    %c0_i32_3 = arith.constant 0 : i32
    %7 = arith.cmpi ne, %6, %c0_i32_3 : i32
    scf.if %7 {
      %cst_12 = arith.constant 0.000000e+00 : f32
      %21 = vector.broadcast %cst_12 : f32 to vector<128x128xf32>
      %c0_13 = arith.constant 0 : index
      %c0_14 = arith.constant 0 : index
      %22 = vector.load %arg9[%c0_13, %c0_14] : memref<128x128xf32, #tpu.memory_space<vmem>>, vector<128x128xf32>
      tpu.vector_store %arg9[%c0_13, %c0_14], %21 {strides = array<i32>} : memref<128x128xf32, #tpu.memory_space<vmem>>, vector<128x128xf32>,
    } else {
    }
    %c128_i32 = arith.constant 128 : i32
    %8 = arith.muli %arg2, %c128_i32 : i32
    %9 = tpu.assume_multiple %8, 128 : i32
    %10 = arith.index_cast %9 : i32 to index
    %c0 = arith.constant 0 : index
    %11 = vector.load %arg8[%10, %c0] : memref<256x256xbf16, #tpu.memory_space<vmem>>, vector<128x128xbf16>
    %c0_4 = arith.constant 0 : index
    %c0_5 = arith.constant 0 : index
    %12 = vector.load %arg9[%c0_4, %c0_5] : memref<128x128xf32, #tpu.memory_space<vmem>>, vector<128x128xf32>
    %c0_6 = arith.constant 0 : index
    %c0_7 = arith.constant 0 : index
    %c0_8 = arith.constant 0 : index
    %13 = vector.load %arg5[%c0_6, %c0_7, %c0_8] : memref<1x128x128xbf16, #tpu.memory_space<vmem>>, vector<1x128x128xbf16>
    %14 = vector.shape_cast %13 : vector<1x128x128xbf16> to vector<128x128xbf16>
    %cst = arith.constant dense<0.000000e+00> : vector<128x128xf32>
    %15 = tpu.matmul %14, %11, %cst {dimension_numbers = #tpu.dot_dimension_numbers<[1], [0], [0], [1], [0, 0, 1, 1], [], []>} : vector<128x128xbf16>, vector<128x128xbf16>, vector<128x128xf32> -> vector<128x128xf32>
    %16 = arith.addf %12, %15 : vector<128x128xf32>
    %c0_9 = arith.constant 0 : index
    %c0_10 = arith.constant 0 : index
    %17 = vector.load %arg9[%c0_9, %c0_10] : memref<128x128xf32, #tpu.memory_space<vmem>>, vector<128x128xf32>
    tpu.vector_store %arg9[%c0_9, %c0_10], %16 {strides = array<i32>} : memref<128x128xf32, #tpu.memory_space<vmem>>, vector<128x128xf32>,
    %c1_i32 = arith.constant 1 : i32
    %18 = arith.cmpi eq, %arg2, %c1_i32 : i32
    %19 = arith.extui %18 : i1 to i32
    %c0_i32_11 = arith.constant 0 : i32
    %20 = arith.cmpi ne, %19, %c0_i32_11 : i32
    scf.if %20 {
      %c128_i32_12 = arith.constant 128 : i32
      %21 = arith.muli %arg1, %c128_i32_12 : i32
      %22 = tpu.assume_multiple %21, 128 : i32
      %23 = arith.index_cast %22 : i32 to index
      %c128 = arith.constant 128 : index
      %24 = vector.load %arg8[%23, %c128] : memref<256x256xbf16, #tpu.memory_space<vmem>>, vector<128x128xbf16>
      %25 = arith.extf %24 : vector<128x128xbf16> to vector<128x128xf32>
      %cst_13 = arith.constant 2.000000e-01 : f32
      %26 = vector.broadcast %cst_13 : f32 to vector<128x128xf32>
      %27 = arith.mulf %26, %25 : vector<128x128xf32>
      %c0_14 = arith.constant 0 : index
      %c0_15 = arith.constant 0 : index
      %28 = vector.load %arg9[%c0_14, %c0_15] : memref<128x128xf32, #tpu.memory_space<vmem>>, vector<128x128xf32>
      %cst_16 = arith.constant 8.000000e-01 : f32
      %29 = vector.broadcast %cst_16 : f32 to vector<128x128xf32>
      %30 = arith.mulf %29, %28 : vector<128x128xf32>
      %31 = arith.addf %27, %30 : vector<128x128xf32>
      %c0_17 = arith.constant 0 : index
      %32 = memref.load %arg3[%c0_17] : memref<1xf32, #tpu.memory_space<smem>>
      %cst_18 = arith.constant 0.000000e+00 : f32
      %33 = vector.broadcast %cst_18 : f32 to vector<128x128xf32>
      %34 = arith.cmpf ogt, %31, %33 : vector<128x128xf32>
      %35 = vector.broadcast %32 : f32 to vector<128x128xf32>
      %36 = arith.mulf %35, %31 : vector<128x128xf32>
      %37 = arith.select %34, %31, %36 : vector<128x128xi1>, vector<128x128xf32>
      %c0_19 = arith.constant 0 : index
      %c0_20 = arith.constant 0 : index
      %c0_21 = arith.constant 0 : index
      %38 = vector.load %arg7[%c0_19, %c0_20, %c0_21] : memref<1x128x128xf32, #tpu.memory_space<vmem>>, vector<1x128x128xf32>
      %39 = vector.shape_cast %38 : vector<1x128x128xf32> to vector<128x128xf32>
      %40 = vector.shape_cast %37 : vector<128x128xf32> to vector<1x128x128xf32>
      tpu.vector_store %arg7[%c0_19, %c0_20, %c0_21], %40 {strides = array<i32>} : memref<1x128x128xf32, #tpu.memory_space<vmem>>, vector<1x128x128xf32>,
    } else {
    }
    return
  }
  func.func @transform_0(%arg0: i32, %arg1: i32, %arg2: i32) -> i32 {
    %c0_i32 = arith.constant 0 : i32
    %c0_i32_0 = arith.constant 0 : i32
    return %c0_i32 : i32
  }
  func.func @transform_1(%arg0: i32, %arg1: i32, %arg2: i32) -> (i32, i32, i32) {
    %c0_i32 = arith.constant 0 : i32
    %c0_i32_0 = arith.constant 0 : i32
    %c0_i32_1 = arith.constant 0 : i32
    return %arg0, %c0_i32, %c0_i32_0 : i32, i32, i32
  }
  func.func @transform_2(%arg0: i32, %arg1: i32, %arg2: i32) -> (i32, i32, i32) {
    %c0_i32 = arith.constant 0 : i32
    return %arg0, %arg1, %arg2 : i32, i32, i32
  }
  func.func @transform_3(%arg0: i32, %arg1: i32, %arg2: i32) -> (i32, i32) {
    %c0_i32 = arith.constant 0 : i32
    %c0_i32_0 = arith.constant 0 : i32
    %c0_i32_1 = arith.constant 0 : i32
    return %c0_i32, %c0_i32_0 : i32, i32
  }
  func.func @transform_4(%arg0: i32, %arg1: i32, %arg2: i32) -> (i32, i32, i32) {
    %c0_i32 = arith.constant 0 : i32
    %c0_i32_0 = arith.constant 0 : i32
    return %arg0, %arg1, %c0_i32 : i32, i32, i32
  }
}

</mosaic_0001>

<bundles_post_ra>
// kernel: tpu_custom_call.1
= control target key start
LH: loop header
LB: loop body
LE: loop exit
PB: predicated region body
PF: predicated region fallthrough
CT: control target
= control target key end

     0   :  { %s2141_s0 = inlined_call_operand.<no memory space> [shape: f32[1], index: 0, kind: input, shape index: {}]   ;;  %s2142_s1 = inlined_call_operand.vmem [shape: bf16[2,256,32], index: 1, kind: input, shape index: {}]   ;;  %s2143_s2 = inlined_call_operand.hbm [shape: bf16[2,256,256], index: 2, kind: input, shape index: {}]   ;;  %s2144_s3 = inlined_call_operand.vmem [shape: bf16[32,256], index: 3, kind: input, shape index: {}]   ;;  %s2145_s4 = inlined_call_operand.hbm [shape: f32[2,256,128], index: 4, kind: output, shape index: {}]  }
   0x1   :  { %2155 = sst [smem:[#allocation16_spill]] %s2144_s3 }
   0x2   :  { %2156 = sst [smem:[#allocation17_spill]] %s2145_s4 }
   0x3   :  { %9 = sst [smem:[#allocation4]] %s2141_s0 }
   0x4   :  { %10 = vsyncpa [#allocation6], 0 }
   0x5   :  { %12 = vsyncpa [#allocation6 + $0x1], 0 }
   0x6   :  { %13 = vsyncpa [#allocation7], 0 }
   0x7   :  { %15 = vsyncpa [#allocation7 + $0x1], 0  ;;  %s1758_s17 = smov 0   ;;  %s1760_s18 = smov 0  }
   0x8   :  { %s1762_s19 = smov 0   ;;  %s1764_s20 = smov 0  }
   0x9   :  { %s1766_s21 = smov 0   ;;  %s1768_s22 = smov 0  }
   0xa   :  { %s1770_s23 = smov 0   ;;  %s1772_s24 = smov 0  }
   0xb   :  { %s1774_s0 = smov 0   ;;  %s1776_s25 = smov 0  }
   0xc   :  { %s1778_s26 = smov 0   ;;  %s1780_s27 = smov 0  }
   0xd   :  { %s1782_s28 = smov 0  }
   0xe LB: > { %2157 = sst [smem:[#allocation11_spill]] %s1671_s17  ;;  %s1252_s29 = sadd.s32 4294967295, %s1719_s28   ;;  %s1719_s28 = sphi %s1782_s28, %s21_s28   ;;  %s1715_s27 = sphi %s1780_s27, %s2190_s27   ;;  %s1711_s26 = sphi %s1778_s26, %s2189_s26   ;;  %s1707_s25 = sphi %s1776_s25, %s2188_s25   ;;  %s1703_s0 = sphi %s1774_s0, %s2187_s0   ;;  %s1699_s24 = sphi %s1772_s24, %s2186_s24   ;;  %s1695_s23 = sphi %s1770_s23, %s2185_s23   ;;  %s1691_s22 = sphi %s1768_s22, %s2184_s22   ;;  %s1687_s21 = sphi %s1766_s21, %s2183_s21   ;;  %s1683_s20 = sphi %s1764_s20, %s2182_s20   ;;  %s1679_s19 = sphi %s1762_s19, %s2181_s19   ;;  %s1675_s18 = sphi %s1760_s18, %s2180_s18   ;;  %s1671_s17 = sphi %s1758_s17, %s2179_s17  }
   0xf   : > { %s1253_s30 = sadd.s32 4294967294, %s1719_s28   ;;  %s33_s5 = sadd.s32 1, %s1707_s25 }
  0x10   : > { %s36_s6 = sadd.s32 1, %s1711_s26  ;;  %p34_p0 = scmp.ge.s32.totalorder %s33_s5, 2 }
  0x11   : > { %s40_s7 = sadd.s32 1, %s1715_s27  ;;  %p105_p1 = scmp.ne.s32.totalorder %s1691_s22, %s1687_s21 }
  0x12   : > { %s2192_s5 = smov (%p34_p0, %s33_s5), 0  ;;  %s2194_s6 = smov (!%p34_p0, %s36_s6), %s1711_s26 }
  0x13   : > { %2158 = sst [smem:[#allocation12_spill]] %s2192_s5  ;;  %s94_s9 = ssub.s32 %s1707_s25, %s2192_s5 }
  0x14   : > { %p106_p2 = scmp.eq.s32.totalorder %s1719_s28, 0  ;;  %p38_p3 = scmp.ge.s32.totalorder %s2194_s6, 2 }
  0x15   : > { %p111_p4 = scmp.ne.s32.totalorder %s1687_s21, %s1683_s20  ;;  %p112_p6 = scmp.eq.s32.totalorder %s1252_s29, 0 }
  0x16   : > { %p1839_p5 = por %p106_p2, %p105_p1  ;;  %s2196_s6 = smov (%p38_p3, %s2194_s6), 0 }
  0x17   : > { %2160 = sst [smem:[#allocation13_spill]] %s2196_s6  ;;  %s2198_s7 = smov (!%p38_p3, %s40_s7), %s1715_s27 }
  0x18   : > { %s92_s11 = ssub.s32 %s1711_s26, %s2196_s6  ;;  %p1848_p7 = por %p112_p6, %p111_p4 }
  0x19   : > { %p42_p8 = scmp.ge.s32.totalorder %s2198_s7, 2  ;;  %s147_s13 = sadd.s32 1, %s1679_s19 }
  0x1a   : > { %p157_p9 = scmp.ne.s32.totalorder %s1679_s19, %s1675_s18  ;;  %p158_p10 = scmp.eq.s32.totalorder %s1252_s29, 7 }
  0x1b   : > { %s2200_s7 = smov (%p42_p8, %s2198_s7), 0  ;;  %p163_p12 = scmp.ne.s32.totalorder %s1675_s18, %s1671_s17 }
  0x1c   : > { %2162 = sst [smem:[#allocation14_spill]] %s2200_s7  ;;  %p1857_p11 = por %p158_p10, %p157_p9 }
  0x1d   : > { %s91_s15 = ssub.s32 %s1715_s27, %s2200_s7  ;;  %p164_p13 = scmp.eq.s32.totalorder %s1253_s30, 7 }
  0x1e   : > { %s2163_s14 = scalar_select %p1857_p11, 1, 0 }
  0x1f   : > { %s93_s16 = sor.u32 %s92_s11, %s91_s15  ;;  %p1865_p2 = por %p164_p13, %p163_p12 }
  0x20   : > { %2164 = sst [smem:[#allocation15_spill]] %s2163_s14  ;;  %s95_s20 = sor.u32 %s94_s9, %s93_s16 }
  0x21   : > { %p145_p0 = scmp.eq.s32.totalorder %s93_s16, 0  ;;  %p96_p1 = scmp.eq.s32.totalorder %s95_s20, 0 }
  0x22   : > { %s2165_s29 = scalar_select %p1865_p2, 1, 0 }
  0x23   : > { %s1870_s8 = scalar_select %p145_p0, %s1679_s19, %s147_s13  }
  0x24   : > { %s2166_s6 = sadd.s32 1, %s1691_s22  ;;  %p1408_p3 = scmp.lt.s32.totalorder %s1719_s28, 8 }
  0x25   : > { %s1875_s5 = scalar_select %p96_p1, %s1691_s22, %s2166_s6  }
  0x26   : > { %s198_s4 = sand.u32 1, %s1691_s22   ;;  %s1324_s17 = sshll.u32 %s1711_s26, 5 }
  0x27   : > { %s1256_s14 = sshll.u32 %s198_s4, 6  ;;  %s208_s7 = sadd.s32 %s1707_s25, %s1324_s17 }
  0x28   : > { %s1259_s30 = sshll.u32 %s1715_s27, 6  ;;  %s202_s9 = scalar_lea.vmem [#allocation5], %s1256_s14 }
  0x29   : > { %s210_s11 = sadd.s32 %s1259_s30, %s208_s7  ;;  %s213_s15 = sshll.u32 %s202_s9, 4  ;;  %s1882_s15 = int_to_ptr.vmem [resolvable:$true] %s213_s15 }
  0x2a   : > { %s1260_s16 = sshll.u32 %s210_s11, 6  ;;  %p1891_p4 = pnand %p1408_p3, %p1839_p5 }
  0x2b   : > { %s1887_s13 = scalar_lea.hbm %s2143_s2, %s1260_s16  ;;  %s1895_s17 = scalar_lea.sflag [#allocation6], %s198_s4 }
  0x2c   : > { %s1551_s7 = scalar_lea.hbm %s1887_s13, 1024  ;;  %p1553_p8 = pneg %p1891_p4 }
  0x2d   : > { %p1552_p6 = scmp.ne.s32.totalorder %s1887_s13, %s1551_s7  ;;  %s1556_s14 = scalar_lea.hbm %s2143_s2, 8192 }
  0x2e   : > { %p1557_p5 = scmp.lt.u32.totalorder %s1887_s13, %s2143_s2  ;;  %p1558_p12 = scmp.lt.u32.totalorder %s1556_s14, %s1551_s7 }
  0x2f   : > { %p1554_p9 = pnand %p1553_p8, %p1552_p6  ;;  %p1560_p0 = scmp.lt.u32.totalorder %s1551_s7, %s1887_s13 }
  0x30   : > { %p1559_p13 = por %p1558_p12, %p1557_p5 }
  0x31   : > { %p1555_p10 = pneg %p1554_p9 }
  0x32   : > { %p1561_p1 = por %p1560_p0, %p1559_p13 }
  0x34   : > { %p1562_p3 = pnand %p1561_p1, %p1555_p10 }
  0x36   : > { %1565 = shalt.err (!%p1562_p3)
}
  0x37   : > { %s1566_s4 = scalar_lea.vmem %s1882_s15, 1024  ;;  %s1721_s9 = smov [#allocation5]  }
  0x38   : > { %p1567_p6 = scmp.ne.s32.totalorder %s1882_s15, %s1566_s4  ;;  %s1571_s16 = sshll.u32 %s1721_s9, 4  ;;  %s1572_s16 = int_to_ptr.vmem [resolvable:$false] %s1571_s16 }
  0x39   : > { %s1573_s20 = scalar_lea.vmem %s1572_s16, 2048  ;;  %p1574_p11 = scmp.lt.s32.totalorder %s1882_s15, %s1572_s16 }
  0x3a   : > { %p1569_p9 = pnand %p1567_p6, %p1553_p8  ;;  %p1575_p5 = scmp.lt.s32.totalorder %s1573_s20, %s1566_s4 }
  0x3c   : > { %p1570_p2 = pneg %p1569_p9  ;;  %p1576_p12 = por %p1575_p5, %p1574_p11 }
  0x3e   : > { %p1577_p13 = pnand %p1576_p12, %p1570_p2 }
  0x40   : > { %1580 = shalt.err (!%p1577_p13)
}
  0x41   : > { %s1722_s7 = smov 128   ;;  %s1723_s3 = smov 64  }
  0x42   : > { %s1724_s10 = smov 4   ;;  %p1261_p8 = scmp.ge.s32.totalorder %s1719_s28, 1 }
  0x43   : > { %1403 = dma.hbm_to_vmem [thread:$0]  (!%p1891_p4), %s1887_s13, 1024, %s1882_s15, %s1895_s17, %s1722_s7, %s1723_s3, %s1724_s10  }
  0x44   : > { %p221_p10 = scmp.lt.s32.totalorder %s1719_s28, 9 }
  0x46   : > { %p222_p0 = pnand %p1261_p8, %p221_p10 }
  0x47   : > { %s227_s14 = sand.u32 (!%p222_p0), 1, %s1687_s21  }
  0x48   : > { %225 = sbr.rel (%p222_p0) target bundleno = 699 (0x2bb), region = 36  ;;  %s1262_s30 = sshll.u32 (!%p222_p0), %s227_s14, 6 }
  0x49   : > { %s228_s11 = scalar_lea.sflag (!%p222_p0), [#allocation6], %s227_s14  ;;  %s1926_s4 = scalar_lea.vmem (!%p222_p0), [#allocation5], %s1262_s30 }
  0x4f   : > { %1662 = dma.done.wait (%p1848_p7), %s228_s11, 1024  }
  0x50   : > { %1664 = vsyncadd (%p1848_p7), %s228_s11, 4294966272  ;;  %s258_s15 = sand.u32 1, %s1675_s18   ;;  %p261_p11 = scmp.lt.s32.totalorder %s1703_s0, 1 }
  0x51   : > { %s1263_s13 = sshll.u32 %s258_s15, 7  ;;  %p269_p2 = scmp.eq.s32.totalorder %s1699_s24, 0 }
  0x52   : > { %p270_p4 = scmp.eq.s32.totalorder %s1695_s23, 0  ;;  %s1944_s20 = scalar_lea.vmem [#allocation8], %s1263_s13 }
  0x53   : > { %s262_s6 = scalar_select %p261_p11, %s1703_s0, 1 }
  0x54   : > { %p271_p1 = pnand %p270_p4, %p269_p2 }
  0x55   : > { %s1325_s17 = sshll.u32 %s262_s6, 7  ;;  %s2168_s10 = sld [smem:[#allocation16_spill]] (!%p271_p1)  ;;  %v1725_v2 = vmov (!%p271_p1), 0   ;;  %vm411_vm0 = vcmask (!%p271_p1), 261120  }
  0x56   : > { %s1942_s12 = scalar_lea.vmem %s2142_s1, %s1325_s17  ;;  %274 = sbr.rel (%p271_p1) target bundleno = 374 (0x176), region = 44  ;;  %492 = vmatprep.mubr.bf16.mxu0 (!%p271_p1), %v1725_v2  ;;  %572 = vmatprep.mubr.bf16.mxu1 (!%p271_p1), %v1725_v2 }
  0x57   : > { %v1527_v5 = vld [vmem:[%s1942_s12] sm:$0xff] (!%p271_p1)   ;;  %v1529_v7 = vld [vmem:[%s1942_s12 + $0x8] sm:$0xff] (!%p271_p1)   ;;  %v1531_v9 = vld [vmem:[%s1942_s12 + $0x10] sm:$0xff] (!%p271_p1)  }
  0x58   : > { %v1528_v6 = vld [vmem:[%s1942_s12 + $0x40] sm:$0xff] (!%p271_p1)   ;;  %v1530_v8 = vld [vmem:[%s1942_s12 + $0x48] sm:$0xff] (!%p271_p1)   ;;  %v1532_v10 = vld [vmem:[%s1942_s12 + $0x50] sm:$0xff] (!%p271_p1)  }
  0x59   : > { %v1533_v11 = vld [vmem:[%s1942_s12 + $0x18] sm:$0xff] (!%p271_p1)   ;;  %v1535_v13 = vld [vmem:[%s1942_s12 + $0x20] sm:$0xff] (!%p271_p1)   ;;  %v1537_v15 = vld [vmem:[%s1942_s12 + $0x28] sm:$0xff] (!%p271_p1)  }
  0x5a   : > { %v1534_v12 = vld [vmem:[%s1942_s12 + $0x58] sm:$0xff] (!%p271_p1)   ;;  %v1536_v14 = vld [vmem:[%s1942_s12 + $0x60] sm:$0xff] (!%p271_p1)   ;;  %v1538_v16 = vld [vmem:[%s1942_s12 + $0x68] sm:$0xff] (!%p271_p1)  }
  0x5b   : > { %v1521_v0 = vld [vmem:[%s2168_s10 + $0x4] ss:$8 sps:$4 sm:$0xff] (!%p271_p1)   ;;  %v1523_v1 = vld [vmem:[%s2168_s10] ss:$8 sps:$4 sm:$0xff] (!%p271_p1)   ;;  %v1524_v3 = vld [vmem:[%s2168_s10 + $0x14] ss:$8 sps:$4 sm:$0xff] (!%p271_p1)  }
  0x5c   : > { %460 = vmatprep.subr.bf16.mxu0 (!%p271_p1), %v1521_v0  ;;  %1376 = vmatprep.subr.bf16.mxu1 (!%p271_p1), %v1521_v0  ;;  %v1526_v4 = vld [vmem:[%s2168_s10 + $0x10] ss:$8 sps:$4 sm:$0xff] (!%p271_p1)  }
  0x5d   : > { %461 = vmatpush1.bf16.msra.mxu0 %v1523_v1  ;;  %1378 = vmatpush1.bf16.msra.mxu1 %v1523_v1  ;;  %v1539_v17 = vld [vmem:[%s1942_s12 + $0x30] sm:$0xff]   ;;  %v1541_v19 = vld [vmem:[%s1942_s12 + $0x38] sm:$0xff]  }
  0x5e   : > { %462 = vmatprep.subr.bf16.mxu0 %v1524_v3  ;;  %1377 = vmatprep.subr.bf16.mxu1 %v1524_v3  ;;  %v1540_v18 = vld [vmem:[%s1942_s12 + $0x70] sm:$0xff]   ;;  %v1542_v20 = vld [vmem:[%s1942_s12 + $0x78] sm:$0xff]  }
  0x61   : > { %463 = vmatpush1.bf16.msra.mxu0 %v1526_v4  ;;  %1379 = vmatpush1.bf16.msra.mxu1 %v1526_v4 }
  0x64   : > { %1286 = vmatmul.mubr.msk.bf16.vlgmr.msra.gmra.mrb[0].mxu0 %vm411_vm0, %v1527_v5  ;;  %1294 = vmatmul.mubr.msk.bf16.vlgmr.msra.gmra.mrb[0].mxu1 %vm411_vm0, %v1528_v6 }
  0x65   : > { %502 = vmatprep.mubr.bf16.mxu0 %v1725_v2  ;;  %582 = vmatprep.mubr.bf16.mxu1 %v1725_v2 }
  0x6c   : > { %1287 = vmatmul.mubr.msk.bf16.gmra.mrb[4].mxu0 %vm411_vm0, %v1529_v7  ;;  %1295 = vmatmul.mubr.msk.bf16.gmra.mrb[4].mxu1 %vm411_vm0, %v1530_v8 }
  0x6d   : > { %512 = vmatprep.mubr.bf16.mxu0 %v1725_v2  ;;  %592 = vmatprep.mubr.bf16.mxu1 %v1725_v2 }
  0x74   : > { %1288 = vmatmul.mubr.msk.bf16.gmra.mrb[8].mxu0 %vm411_vm0, %v1531_v9  ;;  %1296 = vmatmul.mubr.msk.bf16.gmra.mrb[8].mxu1 %vm411_vm0, %v1532_v10 }
  0x75   : > { %522 = vmatprep.mubr.bf16.mxu0 %v1725_v2  ;;  %602 = vmatprep.mubr.bf16.mxu1 %v1725_v2 }
  0x7c   : > { %1289 = vmatmul.mubr.msk.bf16.gmra.mrb[12].mxu0 %vm411_vm0, %v1533_v11  ;;  %1297 = vmatmul.mubr.msk.bf16.gmra.mrb[12].mxu1 %vm411_vm0, %v1534_v12 }
  0x7d   : > { %532 = vmatprep.mubr.bf16.mxu0 %v1725_v2  ;;  %612 = vmatprep.mubr.bf16.mxu1 %v1725_v2 }
  0x84   : > { %1290 = vmatmul.mubr.msk.bf16.gmra.mrb[16].mxu0 %vm411_vm0, %v1535_v13  ;;  %1298 = vmatmul.mubr.msk.bf16.gmra.mrb[16].mxu1 %vm411_vm0, %v1536_v14 }
  0x85   : > { %542 = vmatprep.mubr.bf16.mxu0 %v1725_v2  ;;  %622 = vmatprep.mubr.bf16.mxu1 %v1725_v2 }
  0x8c   : > { %1291 = vmatmul.mubr.msk.bf16.gmra.mrb[20].mxu0 %vm411_vm0, %v1537_v15  ;;  %1299 = vmatmul.mubr.msk.bf16.gmra.mrb[20].mxu1 %vm411_vm0, %v1538_v16 }
  0x8d   : > { %552 = vmatprep.mubr.bf16.mxu0 %v1725_v2  ;;  %632 = vmatprep.mubr.bf16.mxu1 %v1725_v2 }
  0x94   : > { %1292 = vmatmul.mubr.msk.bf16.gmra.mrb[24].mxu0 %vm411_vm0, %v1539_v17  ;;  %1300 = vmatmul.mubr.msk.bf16.gmra.mrb[24].mxu1 %vm411_vm0, %v1540_v18 }
  0x95   : > { %562 = vmatprep.mubr.bf16.mxu0 %v1725_v2  ;;  %642 = vmatprep.mubr.bf16.mxu1 %v1725_v2 }
  0x9c   : > { %1293 = vmatmul.mubr.msk.bf16.gmra.mrb[28].mxu0 %vm411_vm0, %v1541_v19  ;;  %1301 = vmatmul.mubr.msk.bf16.gmra.mrb[28].mxu1 %vm411_vm0, %v1542_v20 }
 0x137   : > { %v494_v21 = vpop.f32.mrb[0].mxu0  ;;  %v574_v22 = vpop.f32.mrb[0].mxu1 }
 0x138   : > { %v496_v23 = vpop.f32.mrb[1].mxu0  ;;  %v576_v24 = vpop.f32.mrb[1].mxu1 }
 0x139   : > { %v498_v25 = vpop.f32.mrb[2].mxu0  ;;  %v578_v26 = vpop.f32.mrb[2].mxu1 }
 0x13a   : > { %v653_v27 = vpack.c.bf16 %v498_v25, %v494_v21  ;;  %v669_v28 = vpack.c.bf16 %v578_v26, %v574_v22  ;;  %v500_v29 = vpop.f32.mrb[3].mxu0  ;;  %v580_v30 = vpop.f32.mrb[3].mxu1 }
 0x13b   : > { %v654_v31 = vpack.c.bf16 %v500_v29, %v496_v23  ;;  %v670_v32 = vpack.c.bf16 %v580_v30, %v576_v24 }
 0x13c   : > { %685 = vst [vmem:[#allocation2] sm:$0xff] %v653_v27  ;;  %701 = vst [vmem:[#allocation2 + $0x80] sm:$0xff] %v669_v28 }
 0x13d   : > { %686 = vst [vmem:[#allocation2 + $0x8] sm:$0xff] %v654_v31  ;;  %702 = vst [vmem:[#allocation2 + $0x88] sm:$0xff] %v670_v32 }
 0x13f   : > { %v504_v33 = vpop.f32.mrb[4].mxu0  ;;  %v584_v34 = vpop.f32.mrb[4].mxu1 }
 0x140   : > { %v506_v35 = vpop.f32.mrb[5].mxu0  ;;  %v586_v36 = vpop.f32.mrb[5].mxu1 }
 0x141   : > { %v508_v37 = vpop.f32.mrb[6].mxu0  ;;  %v588_v38 = vpop.f32.mrb[6].mxu1 }
 0x142   : > { %v655_v39 = vpack.c.bf16 %v508_v37, %v504_v33  ;;  %v671_v40 = vpack.c.bf16 %v588_v38, %v584_v34  ;;  %v510_v41 = vpop.f32.mrb[7].mxu0  ;;  %v590_v42 = vpop.f32.mrb[7].mxu1 }
 0x143   : > { %v656_v43 = vpack.c.bf16 %v510_v41, %v506_v35  ;;  %v672_v44 = vpack.c.bf16 %v590_v42, %v586_v36 }
 0x144   : > { %687 = vst [vmem:[#allocation2 + $0x10] sm:$0xff] %v655_v39  ;;  %703 = vst [vmem:[#allocation2 + $0x90] sm:$0xff] %v671_v40 }
 0x145   : > { %688 = vst [vmem:[#allocation2 + $0x18] sm:$0xff] %v656_v43  ;;  %704 = vst [vmem:[#allocation2 + $0x98] sm:$0xff] %v672_v44 }
 0x147   : > { %v514_v45 = vpop.f32.mrb[8].mxu0  ;;  %v594_v46 = vpop.f32.mrb[8].mxu1 }
 0x148   : > { %v516_v47 = vpop.f32.mrb[9].mxu0  ;;  %v596_v48 = vpop.f32.mrb[9].mxu1 }
 0x149   : > { %v518_v49 = vpop.f32.mrb[10].mxu0  ;;  %v598_v50 = vpop.f32.mrb[10].mxu1 }
 0x14a   : > { %v657_v51 = vpack.c.bf16 %v518_v49, %v514_v45  ;;  %v673_v52 = vpack.c.bf16 %v598_v50, %v594_v46  ;;  %v520_v53 = vpop.f32.mrb[11].mxu0  ;;  %v600_v54 = vpop.f32.mrb[11].mxu1 }
 0x14b   : > { %v658_v55 = vpack.c.bf16 %v520_v53, %v516_v47  ;;  %v674_v56 = vpack.c.bf16 %v600_v54, %v596_v48 }
 0x14c   : > { %689 = vst [vmem:[#allocation2 + $0x20] sm:$0xff] %v657_v51  ;;  %705 = vst [vmem:[#allocation2 + $0xa0] sm:$0xff] %v673_v52 }
 0x14d   : > { %690 = vst [vmem:[#allocation2 + $0x28] sm:$0xff] %v658_v55  ;;  %706 = vst [vmem:[#allocation2 + $0xa8] sm:$0xff] %v674_v56 }
 0x14f   : > { %v524_v57 = vpop.f32.mrb[12].mxu0  ;;  %v604_v58 = vpop.f32.mrb[12].mxu1 }
 0x150   : > { %v526_v59 = vpop.f32.mrb[13].mxu0  ;;  %v606_v60 = vpop.f32.mrb[13].mxu1 }
 0x151   : > { %v528_v61 = vpop.f32.mrb[14].mxu0  ;;  %v608_v62 = vpop.f32.mrb[14].mxu1 }
 0x152   : > { %v659_v63 = vpack.c.bf16 %v528_v61, %v524_v57  ;;  %v675_v0 = vpack.c.bf16 %v608_v62, %v604_v58  ;;  %v530_v1 = vpop.f32.mrb[15].mxu0  ;;  %v610_v2 = vpop.f32.mrb[15].mxu1 }
 0x153   : > { %v660_v3 = vpack.c.bf16 %v530_v1, %v526_v59  ;;  %v676_v4 = vpack.c.bf16 %v610_v2, %v606_v60 }
 0x154   : > { %691 = vst [vmem:[#allocation2 + $0x30] sm:$0xff] %v659_v63  ;;  %707 = vst [vmem:[#allocation2 + $0xb0] sm:$0xff] %v675_v0 }
 0x155   : > { %692 = vst [vmem:[#allocation2 + $0x38] sm:$0xff] %v660_v3  ;;  %708 = vst [vmem:[#allocation2 + $0xb8] sm:$0xff] %v676_v4 }
 0x157   : > { %v534_v5 = vpop.f32.mrb[16].mxu0  ;;  %v614_v6 = vpop.f32.mrb[16].mxu1 }
 0x158   : > { %v536_v7 = vpop.f32.mrb[17].mxu0  ;;  %v616_v8 = vpop.f32.mrb[17].mxu1 }
 0x159   : > { %v538_v9 = vpop.f32.mrb[18].mxu0  ;;  %v618_v10 = vpop.f32.mrb[18].mxu1 }
 0x15a   : > { %v661_v11 = vpack.c.bf16 %v538_v9, %v534_v5  ;;  %v677_v12 = vpack.c.bf16 %v618_v10, %v614_v6  ;;  %v540_v13 = vpop.f32.mrb[19].mxu0  ;;  %v620_v14 = vpop.f32.mrb[19].mxu1 }
 0x15b   : > { %v662_v15 = vpack.c.bf16 %v540_v13, %v536_v7  ;;  %v678_v16 = vpack.c.bf16 %v620_v14, %v616_v8 }
 0x15c   : > { %693 = vst [vmem:[#allocation2 + $0x40] sm:$0xff] %v661_v11  ;;  %709 = vst [vmem:[#allocation2 + $0xc0] sm:$0xff] %v677_v12 }
 0x15d   : > { %694 = vst [vmem:[#allocation2 + $0x48] sm:$0xff] %v662_v15  ;;  %710 = vst [vmem:[#allocation2 + $0xc8] sm:$0xff] %v678_v16 }
 0x15f   : > { %v544_v17 = vpop.f32.mrb[20].mxu0  ;;  %v624_v18 = vpop.f32.mrb[20].mxu1 }
 0x160   : > { %v546_v19 = vpop.f32.mrb[21].mxu0  ;;  %v626_v20 = vpop.f32.mrb[21].mxu1 }
 0x161   : > { %v548_v21 = vpop.f32.mrb[22].mxu0  ;;  %v628_v22 = vpop.f32.mrb[22].mxu1 }
 0x162   : > { %v663_v23 = vpack.c.bf16 %v548_v21, %v544_v17  ;;  %v679_v24 = vpack.c.bf16 %v628_v22, %v624_v18  ;;  %v550_v25 = vpop.f32.mrb[23].mxu0  ;;  %v630_v26 = vpop.f32.mrb[23].mxu1 }
 0x163   : > { %v664_v27 = vpack.c.bf16 %v550_v25, %v546_v19  ;;  %v680_v28 = vpack.c.bf16 %v630_v26, %v626_v20 }
 0x164   : > { %695 = vst [vmem:[#allocation2 + $0x50] sm:$0xff] %v663_v23  ;;  %711 = vst [vmem:[#allocation2 + $0xd0] sm:$0xff] %v679_v24 }
 0x165   : > { %696 = vst [vmem:[#allocation2 + $0x58] sm:$0xff] %v664_v27  ;;  %712 = vst [vmem:[#allocation2 + $0xd8] sm:$0xff] %v680_v28 }
 0x167   : > { %v554_v29 = vpop.f32.mrb[24].mxu0  ;;  %v634_v30 = vpop.f32.mrb[24].mxu1 }
 0x168   : > { %v556_v31 = vpop.f32.mrb[25].mxu0  ;;  %v636_v32 = vpop.f32.mrb[25].mxu1 }
 0x169   : > { %v558_v33 = vpop.f32.mrb[26].mxu0  ;;  %v638_v34 = vpop.f32.mrb[26].mxu1 }
 0x16a   : > { %v665_v35 = vpack.c.bf16 %v558_v33, %v554_v29  ;;  %v681_v36 = vpack.c.bf16 %v638_v34, %v634_v30  ;;  %v560_v37 = vpop.f32.mrb[27].mxu0  ;;  %v640_v38 = vpop.f32.mrb[27].mxu1 }
 0x16b   : > { %v666_v39 = vpack.c.bf16 %v560_v37, %v556_v31  ;;  %v682_v40 = vpack.c.bf16 %v640_v38, %v636_v32 }
 0x16c   : > { %697 = vst [vmem:[#allocation2 + $0x60] sm:$0xff] %v665_v35  ;;  %713 = vst [vmem:[#allocation2 + $0xe0] sm:$0xff] %v681_v36 }
 0x16d   : > { %698 = vst [vmem:[#allocation2 + $0x68] sm:$0xff] %v666_v39  ;;  %714 = vst [vmem:[#allocation2 + $0xe8] sm:$0xff] %v682_v40 }
 0x16f   : > { %v564_v41 = vpop.f32.mrb[28].mxu0  ;;  %v644_v42 = vpop.f32.mrb[28].mxu1 }
 0x170   : > { %v566_v43 = vpop.f32.mrb[29].mxu0  ;;  %v646_v44 = vpop.f32.mrb[29].mxu1 }
 0x171   : > { %v568_v45 = vpop.f32.mrb[30].mxu0  ;;  %v648_v46 = vpop.f32.mrb[30].mxu1 }
 0x172   : > { %v667_v47 = vpack.c.bf16 %v568_v45, %v564_v41  ;;  %v683_v48 = vpack.c.bf16 %v648_v46, %v644_v42  ;;  %v570_v49 = vpop.f32.mrb[31].mxu0  ;;  %v650_v50 = vpop.f32.mrb[31].mxu1 }
 0x173   : > { %v668_v51 = vpack.c.bf16 %v570_v49, %v566_v43  ;;  %v684_v52 = vpack.c.bf16 %v650_v50, %v646_v44 }
 0x174   : > { %699 = vst [vmem:[#allocation2 + $0x70] sm:$0xff] %v667_v47  ;;  %715 = vst [vmem:[#allocation2 + $0xf0] sm:$0xff] %v683_v48 }
 0x175   : > { %700 = vst [vmem:[#allocation2 + $0x78] sm:$0xff] %v668_v51  ;;  %716 = vst [vmem:[#allocation2 + $0xf8] sm:$0xff] %v684_v52 }
 0x176 PF: > { %p1302_p7 = scmp.ne.s32.totalorder %s1695_s23, 0 }
 0x177   : > { %v1726_v53 = vmov (!%p1302_p7), 0.0  }
 0x178   : > { %719 = sbr.rel (%p1302_p7) target bundleno = 384 (0x180), region = 48  ;;  %720 = vst [vmem:[#allocation3] sm:$0xff] (!%p1302_p7), %v1726_v53  ;;  %721 = vst [vmem:[#allocation3 + $0x8] sm:$0xff] (!%p1302_p7), %v1726_v53 }
 0x179   : > { %722 = vst [vmem:[#allocation3 + $0x10] sm:$0xff] (!%p1302_p7), %v1726_v53  ;;  %723 = vst [vmem:[#allocation3 + $0x18] sm:$0xff] (!%p1302_p7), %v1726_v53 }
 0x17a   : > { %724 = vst [vmem:[#allocation3 + $0x20] sm:$0xff] (!%p1302_p7), %v1726_v53  ;;  %725 = vst [vmem:[#allocation3 + $0x28] sm:$0xff] (!%p1302_p7), %v1726_v53 }
 0x17b   : > { %726 = vst [vmem:[#allocation3 + $0x30] sm:$0xff] (!%p1302_p7), %v1726_v53  ;;  %727 = vst [vmem:[#allocation3 + $0x38] sm:$0xff] (!%p1302_p7), %v1726_v53 }
 0x17c   : > { %728 = vst [vmem:[#allocation3 + $0x40] sm:$0xff] (!%p1302_p7), %v1726_v53  ;;  %729 = vst [vmem:[#allocation3 + $0x48] sm:$0xff] (!%p1302_p7), %v1726_v53 }
 0x17d   : > { %730 = vst [vmem:[#allocation3 + $0x50] sm:$0xff] (!%p1302_p7), %v1726_v53  ;;  %731 = vst [vmem:[#allocation3 + $0x58] sm:$0xff] (!%p1302_p7), %v1726_v53 }
 0x17e   : > { %732 = vst [vmem:[#allocation3 + $0x60] sm:$0xff] (!%p1302_p7), %v1726_v53  ;;  %733 = vst [vmem:[#allocation3 + $0x68] sm:$0xff] (!%p1302_p7), %v1726_v53 }
 0x17f   : > { %734 = vst [vmem:[#allocation3 + $0x70] sm:$0xff] %v1726_v53  ;;  %735 = vst [vmem:[#allocation3 + $0x78] sm:$0xff] %v1726_v53 }
 0x180 PF: > { %s1303_s9 = sshll.u32 %s1695_s23, 7  ;;  %v1543_v54 = vld [vmem:[%s1926_s4] sm:$0xff]   ;;  %v1545_v0 = vld [vmem:[%s1926_s4 + $0x8] sm:$0xff]   ;;  %v1547_v2 = vld [vmem:[%s1926_s4 + $0x10] sm:$0xff]   ;;  %p1314_p3 = scmp.ne.s32.totalorder %s1695_s23, 1 }
 0x181   : > { %s1993_s16 = scalar_lea.vmem [#allocation2], %s1303_s9  ;;  %1360 = vmatprep.mubr.bf16.mxu0 %v1543_v54  ;;  %v1544_v57 = vld [vmem:[%s1926_s4 + $0x20] sm:$0xff]   ;;  %v1546_v1 = vld [vmem:[%s1926_s4 + $0x28] sm:$0xff]   ;;  %v1548_v3 = vld [vmem:[%s1926_s4 + $0x30] sm:$0xff]   ;;  %s1057_s12 = sld [smem:[#allocation4]] (!%p1314_p3) }
 0x182   : > { %v742_v55 = vld [vmem:[%s1993_s16] sm:$0xff]  ;;  %v743_v56 = vld [vmem:[%s1993_s16 + $0x10] sm:$0xff]  ;;  %1368 = vmatprep.mubr.bf16.mxu1 %v1544_v57  ;;  %v1549_v4 = vld [vmem:[%s1926_s4 + $0x18] sm:$0xff]  }
 0x183   : > { %1344 = vmatprep.subr.bf16.mxu0 %v742_v55  ;;  %1380 = vmatprep.subr.bf16.mxu1 %v742_v55  ;;  %v744_v58 = vld [vmem:[%s1993_s16 + $0x20] sm:$0xff]  ;;  %v745_v59 = vld [vmem:[%s1993_s16 + $0x30] sm:$0xff]  ;;  %v1550_v5 = vld [vmem:[%s1926_s4 + $0x38] sm:$0xff]   ;;  %s1315_s4 = sshll.u32 (!%p1314_p3), %s1699_s24, 7 }
 0x184   : > { %1345 = vmatpush3.bf16.msra.mxu0 %v742_v55  ;;  %1388 = vmatpush3.bf16.msra.mxu1 %v742_v55  ;;  %v746_v60 = vld [vmem:[%s1993_s16 + $0x40] sm:$0xff]  ;;  %v747_v61 = vld [vmem:[%s1993_s16 + $0x50] sm:$0xff]  ;;  %v753_v12 = vld [vmem:[#allocation3 + $0x18] sm:$0xff]  ;;  %s2012_s7 = scalar_lea.vmem (!%p1314_p3), [#allocation2], %s1315_s4 }
 0x185   : > { %1346 = vmatprep.subr.bf16.mxu0 %v743_v56  ;;  %1381 = vmatprep.subr.bf16.mxu1 %v743_v56  ;;  %v748_v62 = vld [vmem:[%s1993_s16 + $0x60] sm:$0xff]  ;;  %v749_v63 = vld [vmem:[%s1993_s16 + $0x70] sm:$0xff]  ;;  %v761_v13 = vld [vmem:[#allocation3 + $0x58] sm:$0xff] }
 0x186   : > { %v752_v6 = vld [vmem:[#allocation3 + $0x10] sm:$0xff]  ;;  %v750_v8 = vld [vmem:[#allocation3] sm:$0xff]  ;;  %v751_v18 = vld [vmem:[#allocation3 + $0x8] sm:$0xff] }
 0x187   : > { %v760_v7 = vld [vmem:[#allocation3 + $0x50] sm:$0xff]  ;;  %v758_v9 = vld [vmem:[#allocation3 + $0x40] sm:$0xff]  ;;  %v759_v19 = vld [vmem:[#allocation3 + $0x48] sm:$0xff] }
 0x188   : > { %1347 = vmatpush3.bf16.msra.mxu0 %v743_v56  ;;  %1389 = vmatpush3.bf16.msra.mxu1 %v743_v56  ;;  %v756_v30 = vld [vmem:[#allocation3 + $0x30] sm:$0xff]  ;;  %v754_v32 = vld [vmem:[#allocation3 + $0x20] sm:$0xff]  ;;  %v757_v36 = vld [vmem:[#allocation3 + $0x38] sm:$0xff] }
 0x189   : > { %1348 = vmatprep.subr.bf16.mxu0 %v744_v58  ;;  %1382 = vmatprep.subr.bf16.mxu1 %v744_v58  ;;  %v764_v31 = vld [vmem:[#allocation3 + $0x70] sm:$0xff]  ;;  %v762_v33 = vld [vmem:[#allocation3 + $0x60] sm:$0xff]  ;;  %v765_v37 = vld [vmem:[#allocation3 + $0x78] sm:$0xff] }
 0x18a   : > { %v755_v42 = vld [vmem:[#allocation3 + $0x28] sm:$0xff] }
 0x18b   : > { %v763_v43 = vld [vmem:[#allocation3 + $0x68] sm:$0xff] }
 0x18c   : > { %1349 = vmatpush3.bf16.msra.mxu0 %v744_v58  ;;  %1390 = vmatpush3.bf16.msra.mxu1 %v744_v58 }
 0x18d   : > { %1350 = vmatprep.subr.bf16.mxu0 %v745_v59  ;;  %1383 = vmatprep.subr.bf16.mxu1 %v745_v59 }
 0x190   : > { %1351 = vmatpush3.bf16.msra.mxu0 %v745_v59  ;;  %1391 = vmatpush3.bf16.msra.mxu1 %v745_v59 }
 0x191   : > { %1352 = vmatprep.subr.bf16.mxu0 %v746_v60  ;;  %1384 = vmatprep.subr.bf16.mxu1 %v746_v60 }
 0x194   : > { %1353 = vmatpush3.bf16.msra.mxu0 %v746_v60  ;;  %1392 = vmatpush3.bf16.msra.mxu1 %v746_v60  ;;  %v969_v60 = vld [vmem:[%s2012_s7 + $0x8] sm:$0xff] (!%p1314_p3) }
 0x195   : > { %1354 = vmatprep.subr.bf16.mxu0 %v747_v61  ;;  %1385 = vmatprep.subr.bf16.mxu1 %v747_v61 }
 0x198   : > { %1355 = vmatpush3.bf16.msra.mxu0 %v747_v61  ;;  %1393 = vmatpush3.bf16.msra.mxu1 %v747_v61  ;;  %v970_v61 = vld [vmem:[%s2012_s7 + $0x18] sm:$0xff] (!%p1314_p3) }
 0x199   : > { %1356 = vmatprep.subr.bf16.mxu0 %v748_v62  ;;  %1386 = vmatprep.subr.bf16.mxu1 %v748_v62 }
 0x19c   : > { %1357 = vmatpush3.bf16.msra.mxu0 %v748_v62  ;;  %1394 = vmatpush3.bf16.msra.mxu1 %v748_v62 }
 0x19d   : > { %1358 = vmatprep.subr.bf16.mxu0 %v749_v63  ;;  %1387 = vmatprep.subr.bf16.mxu1 %v749_v63 }
 0x1a0   : > { %1359 = vmatpush3.bf16.msra.mxu0 %v749_v63  ;;  %1395 = vmatpush3.bf16.msra.mxu1 %v749_v63 }
 0x1a3   : > { %1361 = vmatmul.mubr.bf16.vlgmr.msra.gmra.mrb[0].mxu0 %v1545_v0  ;;  %1369 = vmatmul.mubr.bf16.vlgmr.msra.gmra.mrb[0].mxu1 %v1546_v1  ;;  %v977_v0 = vunpack.c.l.bf16 (!%p1314_p3), %v969_v60  ;;  %v978_v1 = vunpack.c.h.bf16 (!%p1314_p3), %v969_v60 }
 0x1a4   : > { %1364 = vmatprep.mubr.bf16.mxu0 %v1547_v2  ;;  %1372 = vmatprep.mubr.bf16.mxu1 %v1548_v3  ;;  %v979_v2 = vunpack.c.l.bf16 (!%p1314_p3), %v970_v61  ;;  %v980_v3 = vunpack.c.h.bf16 (!%p1314_p3), %v970_v61 }
 0x1ab   : > { %1365 = vmatmul.mubr.bf16.gmra.mrb[4].mxu0 %v1549_v4  ;;  %1373 = vmatmul.mubr.bf16.gmra.mrb[4].mxu1 %v1550_v5  ;;  %v971_v4 = vld [vmem:[%s2012_s7 + $0x28] sm:$0xff] (!%p1314_p3) }
 0x276   : > { %v1362_v10 = vpop.f32.mrb[0].mxu0  ;;  %v1370_v11 = vpop.f32.mrb[0].mxu1 }
 0x277   : > { %v929_v14 = vadd.f32 %v1362_v10, %v752_v6  ;;  %v937_v15 = vadd.f32 %v1370_v11, %v760_v7  ;;  %v864_v16 = vpop.f32.mrb[1].mxu0  ;;  %v896_v17 = vpop.f32.mrb[1].mxu1  ;;  %v981_v7 = vunpack.c.l.bf16 (!%p1314_p3), %v971_v4  ;;  %v972_v11 = vld [vmem:[%s2012_s7 + $0x38] sm:$0xff] (!%p1314_p3) }
 0x278   : > { %v927_v20 = vadd.f32 %v864_v16, %v750_v8  ;;  %v935_v21 = vadd.f32 %v896_v17, %v758_v9  ;;  %v1363_v22 = vpop.f32.mrb[2].mxu0  ;;  %v1371_v23 = vpop.f32.mrb[2].mxu1  ;;  %v982_v9 = vunpack.c.h.bf16 (!%p1314_p3), %v971_v4  ;;  %v983_v16 = vunpack.c.l.bf16 (!%p1314_p3), %v972_v11 }
 0x279   : > { %945 = vst [vmem:[#allocation3 + $0x10] sm:$0xff] %v929_v14  ;;  %953 = vst [vmem:[#allocation3 + $0x50] sm:$0xff] %v937_v15  ;;  %v930_v24 = vadd.f32 %v1363_v22, %v753_v12  ;;  %v938_v25 = vadd.f32 %v1371_v23, %v761_v13  ;;  %v867_v26 = vpop.f32.mrb[3].mxu0  ;;  %v899_v27 = vpop.f32.mrb[3].mxu1  ;;  %v993_v13 = vmul.f32 (!%p1314_p3), 0.2, %v977_v0  ;;  %v2018_v17 = vstv (!%p1314_p3), %s1057_s12 }
 0x27a   : > { %943 = vst [vmem:[#allocation3] sm:$0xff] %v927_v20  ;;  %951 = vst [vmem:[#allocation3 + $0x40] sm:$0xff] %v935_v21  ;;  %v928_v28 = vadd.f32 %v867_v26, %v751_v18  ;;  %v936_v29 = vadd.f32 %v899_v27, %v759_v19  ;;  %v994_v14 = vmul.f32 (!%p1314_p3), 0.2, %v978_v1  ;;  %v995_v15 = vmul.f32 (!%p1314_p3), 0.2, %v979_v2 }
 0x27b   : > { %946 = vst [vmem:[#allocation3 + $0x18] sm:$0xff] %v930_v24  ;;  %954 = vst [vmem:[#allocation3 + $0x58] sm:$0xff] %v938_v25  ;;  %v996_v18 = vmul.f32 (!%p1314_p3), 0.2, %v980_v3  ;;  %v997_v19 = vmul.f32 (!%p1314_p3), 0.2, %v981_v7 }
 0x27c   : > { %944 = vst [vmem:[#allocation3 + $0x8] sm:$0xff] %v928_v28  ;;  %952 = vst [vmem:[#allocation3 + $0x48] sm:$0xff] %v936_v29  ;;  %v998_v20 = vmul.f32 (!%p1314_p3), 0.2, %v982_v9  ;;  %v999_v24 = vmul.f32 (!%p1314_p3), 0.2, %v983_v16 }
 0x27e   : > { %v1366_v34 = vpop.f32.mrb[4].mxu0  ;;  %v1374_v35 = vpop.f32.mrb[4].mxu1  ;;  %962 = sbr.rel (%p1314_p3) target bundleno = 671 (0x29f), region = 52 }
 0x27f   : > { %v933_v38 = vadd.f32 %v1366_v34, %v756_v30  ;;  %v941_v39 = vadd.f32 %v1374_v35, %v764_v31  ;;  %v880_v40 = vpop.f32.mrb[5].mxu0  ;;  %v912_v41 = vpop.f32.mrb[5].mxu1 }
 0x280   : > { %v931_v44 = vadd.f32 %v880_v40, %v754_v32  ;;  %v939_v45 = vadd.f32 %v912_v41, %v762_v33  ;;  %v1367_v46 = vpop.f32.mrb[6].mxu0  ;;  %v1375_v47 = vpop.f32.mrb[6].mxu1  ;;  %v1011_v56 = vld [vmem:[#allocation3 + $0x10] sm:$0xff] (!%p1314_p3) }
 0x281   : > { %949 = vst [vmem:[#allocation3 + $0x30] sm:$0xff] %v933_v38  ;;  %957 = vst [vmem:[#allocation3 + $0x70] sm:$0xff] %v941_v39  ;;  %v934_v48 = vadd.f32 %v1367_v46, %v757_v36  ;;  %v942_v49 = vadd.f32 %v1375_v47, %v765_v37  ;;  %v883_v50 = vpop.f32.mrb[7].mxu0  ;;  %v915_v51 = vpop.f32.mrb[7].mxu1  ;;  %v1009_v54 = vld [vmem:[#allocation3] sm:$0xff] (!%p1314_p3)  ;;  %v973_v37 = vld [vmem:[%s2012_s7 + $0x48] sm:$0xff] (!%p1314_p3) }
 0x282   : > { %947 = vst [vmem:[#allocation3 + $0x20] sm:$0xff] %v931_v44  ;;  %955 = vst [vmem:[#allocation3 + $0x60] sm:$0xff] %v939_v45  ;;  %v932_v52 = vadd.f32 %v883_v50, %v755_v42  ;;  %v940_v53 = vadd.f32 %v915_v51, %v763_v43  ;;  %v1025_v57 = vmul.f32 (!%p1314_p3), 0.8, %v1009_v54  ;;  %v1012_v59 = vld [vmem:[#allocation3 + $0x18] sm:$0xff] (!%p1314_p3)  ;;  %v1017_v38 = vld [vmem:[#allocation3 + $0x40] sm:$0xff] (!%p1314_p3)  ;;  %v984_v45 = vunpack.c.h.bf16 (!%p1314_p3), %v972_v11 }
 0x283   : > { %950 = vst [vmem:[#allocation3 + $0x38] sm:$0xff] %v934_v48  ;;  %958 = vst [vmem:[#allocation3 + $0x78] sm:$0xff] %v942_v49  ;;  %v1010_v55 = vld [vmem:[#allocation3 + $0x8] sm:$0xff] (!%p1314_p3)  ;;  %v1027_v62 = vmul.f32 (!%p1314_p3), 0.8, %v1011_v56  ;;  %v974_v47 = vld [vmem:[%s2012_s7 + $0x58] sm:$0xff] (!%p1314_p3)  ;;  %v985_v50 = vunpack.c.l.bf16 (!%p1314_p3), %v973_v37 }
 0x284   : > { %948 = vst [vmem:[#allocation3 + $0x28] sm:$0xff] %v932_v52  ;;  %956 = vst [vmem:[#allocation3 + $0x68] sm:$0xff] %v940_v53  ;;  %v1026_v58 = vmul.f32 (!%p1314_p3), 0.8, %v1010_v55  ;;  %v1028_v63 = vmul.f32 (!%p1314_p3), 0.8, %v1012_v59  ;;  %v1041_v21 = vadd.f32 (!%p1314_p3), %v1025_v57, %v993_v13  ;;  %v986_v52 = vunpack.c.h.bf16 (!%p1314_p3), %v973_v37 }
 0x285   : > { %v1043_v23 = vadd.f32 %v1027_v62, %v995_v15  ;;  %v1018_v42 = vld [vmem:[#allocation3 + $0x48] sm:$0xff]  ;;  %v1019_v48 = vld [vmem:[#allocation3 + $0x50] sm:$0xff]  ;;  %v1033_v51 = vmul.f32 0.8, %v1017_v38  ;;  %v1020_v53 = vld [vmem:[#allocation3 + $0x58] sm:$0xff]  ;;  %v987_v61 = vunpack.c.l.bf16 %v974_v47  ;;  %v988_v1 = vunpack.c.h.bf16 %v974_v47 }
 0x286   : > { %v1042_v22 = vadd.f32 %v1026_v58, %v994_v14  ;;  %v1044_v25 = vadd.f32 %v1028_v63, %v996_v18  ;;  %vm1058_vm1 = vcmp.gt.f32.partialorder %v1041_v21, 0.0  ;;  %v1075_v29 = vmul.f32 %v2018_v17, %v1041_v21  ;;  %v975_v54 = vld [vmem:[%s2012_s7 + $0x68] sm:$0xff]  ;;  %v976_v18 = vld [vmem:[%s2012_s7 + $0x78] sm:$0xff] }
 0x287   : > { %vm1060_vm3 = vcmp.gt.f32.partialorder %v1043_v23, 0.0  ;;  %v1077_v31 = vmul.f32 %v2018_v17, %v1043_v23  ;;  %v1000_v56 = vmul.f32 0.2, %v984_v45  ;;  %v1034_v57 = vmul.f32 0.8, %v1018_v42 }
 0x288   : > { %v1015_v12 = vld [vmem:[#allocation3 + $0x30] sm:$0xff]  ;;  %vm1059_vm2 = vcmp.gt.f32.partialorder %v1042_v22, 0.0  ;;  %v1076_v30 = vmul.f32 %v2018_v17, %v1042_v22  ;;  %vm1061_vm4 = vcmp.gt.f32.partialorder %v1044_v25, 0.0  ;;  %v1078_v32 = vmul.f32 %v2018_v17, %v1044_v25 }
 0x289   : > { %v1013_v5 = vld [vmem:[#allocation3 + $0x20] sm:$0xff]  ;;  %v1031_v28 = vmul.f32 0.8, %v1015_v12  ;;  %v1091_v34 = vsel %vm1058_vm1, %v1041_v21, %v1075_v29  ;;  %v1093_v39 = vsel %vm1060_vm3, %v1043_v23, %v1077_v31  ;;  %v1001_v59 = vmul.f32 0.2, %v985_v50 }
 0x28a   : > { %v1029_v8 = vmul.f32 0.8, %v1013_v5  ;;  %v1016_v33 = vld [vmem:[#allocation3 + $0x38] sm:$0xff]  ;;  %v1092_v35 = vsel %vm1059_vm2, %v1042_v22, %v1076_v30  ;;  %1107 = vst [vmem:[%s1944_s20] sm:$0xff] %v1091_v34  ;;  %v1094_v40 = vsel %vm1061_vm4, %v1044_v25, %v1078_v32  ;;  %1109 = vst [vmem:[%s1944_s20 + $0x10] sm:$0xff] %v1093_v39  ;;  %v1021_v58 = vld [vmem:[#allocation3 + $0x60] sm:$0xff]  ;;  %v990_v22 = vunpack.c.h.bf16 %v975_v54 }
 0x28b   : > { %v1014_v6 = vld [vmem:[#allocation3 + $0x28] sm:$0xff]  ;;  %1108 = vst [vmem:[%s1944_s20 + $0x8] sm:$0xff] %v1092_v35  ;;  %1110 = vst [vmem:[%s1944_s20 + $0x18] sm:$0xff] %v1094_v40  ;;  %v1047_v44 = vadd.f32 %v1031_v28, %v999_v24  ;;  %v1032_v46 = vmul.f32 0.8, %v1016_v33  ;;  %v1049_v3 = vadd.f32 %v1033_v51, %v1001_v59  ;;  %v1024_v24 = vld [vmem:[#allocation3 + $0x78] sm:$0xff]  ;;  %v991_v29 = vunpack.c.l.bf16 %v976_v18 }
 0x28c   : > { %v1030_v10 = vmul.f32 0.8, %v1014_v6  ;;  %v1045_v26 = vadd.f32 %v1029_v8, %v997_v19  ;;  %v1002_v60 = vmul.f32 0.2, %v986_v52  ;;  %v1035_v62 = vmul.f32 0.8, %v1019_v48 }
 0x28d   : > { %vm1064_vm7 = vcmp.gt.f32.partialorder %v1047_v44, 0.0  ;;  %v1081_v55 = vmul.f32 %v2018_v17, %v1047_v44  ;;  %v1048_v0 = vadd.f32 %v1032_v46, %v1000_v56  ;;  %v1036_v2 = vmul.f32 0.8, %v1020_v53  ;;  %v1023_v19 = vld [vmem:[#allocation3 + $0x70] sm:$0xff] }
 0x28e   : > { %v1046_v27 = vadd.f32 %v1030_v10, %v998_v20  ;;  %vm1062_vm5 = vcmp.gt.f32.partialorder %v1045_v26, 0.0  ;;  %v1079_v36 = vmul.f32 %v2018_v17, %v1045_v26  ;;  %v1050_v4 = vadd.f32 %v1034_v57, %v1002_v60  ;;  %v1022_v10 = vld [vmem:[#allocation3 + $0x68] sm:$0xff] }
 0x28f   : > { %v1097_v63 = vsel %vm1064_vm7, %v1047_v44, %v1081_v55  ;;  %v1003_v5 = vmul.f32 0.2, %v987_v61  ;;  %v989_v6 = vunpack.c.l.bf16 %v975_v54  ;;  %vm1065_vm8 = vcmp.gt.f32.partialorder %v1048_v0, 0.0 }
 0x290   : > { %vm1063_vm6 = vcmp.gt.f32.partialorder %v1046_v27, 0.0  ;;  %v1080_v41 = vmul.f32 %v2018_v17, %v1046_v27  ;;  %v1095_v43 = vsel %vm1062_vm5, %v1045_v26, %v1079_v36  ;;  %1113 = vst [vmem:[%s1944_s20 + $0x30] sm:$0xff] %v1097_v63  ;;  %v1082_v7 = vmul.f32 %v2018_v17, %v1048_v0 }
 0x291   : > { %1111 = vst [vmem:[%s1944_s20 + $0x20] sm:$0xff] %v1095_v43  ;;  %v1004_v8 = vmul.f32 0.2, %v988_v1  ;;  %v1037_v9 = vmul.f32 0.8, %v1021_v58  ;;  %vm1066_vm9 = vcmp.gt.f32.partialorder %v1049_v3, 0.0  ;;  %v1083_v11 = vmul.f32 %v2018_v17, %v1049_v3 }
 0x292   : > { %v1096_v49 = vsel %vm1063_vm6, %v1046_v27, %v1080_v41  ;;  %vm1067_vm10 = vcmp.gt.f32.partialorder %v1050_v4, 0.0  ;;  %v1084_v12 = vmul.f32 %v2018_v17, %v1050_v4  ;;  %v1098_v13 = vsel %vm1065_vm8, %v1048_v0, %v1082_v7 }
 0x293   : > { %1112 = vst [vmem:[%s1944_s20 + $0x28] sm:$0xff] %v1096_v49  ;;  %v1051_v14 = vadd.f32 %v1035_v62, %v1003_v5  ;;  %v1052_v15 = vadd.f32 %v1036_v2, %v1004_v8  ;;  %v1005_v16 = vmul.f32 0.2, %v989_v6  ;;  %1114 = vst [vmem:[%s1944_s20 + $0x38] sm:$0xff] %v1098_v13  ;;  %v1099_v20 = vsel %vm1066_vm9, %v1049_v3, %v1083_v11 }
 0x294   : > { %v1100_v21 = vsel %vm1067_vm10, %v1050_v4, %v1084_v12  ;;  %v1038_v23 = vmul.f32 0.8, %v1022_v10  ;;  %1115 = vst [vmem:[%s1944_s20 + $0x40] sm:$0xff] %v1099_v20  ;;  %v1006_v28 = vmul.f32 0.2, %v990_v22  ;;  %v992_v33 = vunpack.c.h.bf16 %v976_v18 }
 0x295   : > { %1116 = vst [vmem:[%s1944_s20 + $0x48] sm:$0xff] %v1100_v21  ;;  %vm1068_vm11 = vcmp.gt.f32.partialorder %v1051_v14, 0.0  ;;  %v1085_v25 = vmul.f32 %v2018_v17, %v1051_v14  ;;  %vm1069_vm12 = vcmp.gt.f32.partialorder %v1052_v15, 0.0  ;;  %v1086_v26 = vmul.f32 %v2018_v17, %v1052_v15 }
 0x296   : > { %v1053_v27 = vadd.f32 %v1037_v9, %v1005_v16  ;;  %v1039_v30 = vmul.f32 0.8, %v1023_v19  ;;  %v1040_v34 = vmul.f32 0.8, %v1024_v24  ;;  %v1054_v36 = vadd.f32 %v1038_v23, %v1006_v28 }
 0x297   : > { %v1101_v31 = vsel %vm1068_vm11, %v1051_v14, %v1085_v25  ;;  %v1102_v32 = vsel %vm1069_vm12, %v1052_v15, %v1086_v26  ;;  %v1007_v37 = vmul.f32 0.2, %v991_v29  ;;  %v1008_v38 = vmul.f32 0.2, %v992_v33 }
 0x298   : > { %1117 = vst [vmem:[%s1944_s20 + $0x50] sm:$0xff] %v1101_v31  ;;  %1118 = vst [vmem:[%s1944_s20 + $0x58] sm:$0xff] %v1102_v32  ;;  %vm1070_vm13 = vcmp.gt.f32.partialorder %v1053_v27, 0.0  ;;  %v1087_v35 = vmul.f32 %v2018_v17, %v1053_v27  ;;  %vm1071_vm14 = vcmp.gt.f32.partialorder %v1054_v36, 0.0  ;;  %v1088_v40 = vmul.f32 %v2018_v17, %v1054_v36 }
 0x299   : > { %v1055_v41 = vadd.f32 %v1039_v30, %v1007_v37  ;;  %v1056_v42 = vadd.f32 %v1040_v34, %v1008_v38 }
 0x29a   : > { %v1103_v39 = vsel %vm1070_vm13, %v1053_v27, %v1087_v35  ;;  %v1104_v43 = vsel %vm1071_vm14, %v1054_v36, %v1088_v40 }
 0x29b   : > { %1119 = vst [vmem:[%s1944_s20 + $0x60] sm:$0xff] %v1103_v39  ;;  %vm1072_vm15 = vcmp.gt.f32.partialorder %v1055_v41, 0.0  ;;  %v1089_v44 = vmul.f32 %v2018_v17, %v1055_v41  ;;  %1120 = vst [vmem:[%s1944_s20 + $0x68] sm:$0xff] %v1104_v43  ;;  %vm1073_vm0 = vcmp.gt.f32.partialorder %v1056_v42, 0.0  ;;  %v1090_v45 = vmul.f32 %v2018_v17, %v1056_v42 }
 0x29d   : > { %v1105_v46 = vsel %vm1072_vm15, %v1055_v41, %v1089_v44  ;;  %v1106_v47 = vsel %vm1073_vm0, %v1056_v42, %v1090_v45 }
 0x29e   : > { %1121 = vst [vmem:[%s1944_s20 + $0x70] sm:$0xff] %v1105_v46  ;;  %1122 = vst [vmem:[%s1944_s20 + $0x78] sm:$0xff] %v1106_v47 }
 0x29f PF: > { %s2169_s23 = sld [smem:[#allocation15_spill]]  ;;  %s1319_s3 = sshll.u32 %s1699_s24, 4 }
 0x2a0   : > { %s1320_s14 = sshll.u32 %s1703_s0, 5  ;;  %s1139_s30 = sshll.u32 %s1944_s20, 4  ;;  %s2059_s30 = int_to_ptr.vmem [resolvable:$true] %s1139_s30 }
 0x2a1   : > { %s1136_s11 = sadd.s32 %s1320_s14, %s1319_s3  ;;  %s2170_s9 = sld [smem:[#allocation17_spill]] }
 0x2a2   : > { %s1321_s6 = sshll.u32 %s1136_s11, 7  ;;  %s2068_s4 = scalar_lea.sflag [#allocation7], %s258_s15 }
 0x2a3   : > { %s1581_s12 = scalar_lea.vmem %s2059_s30, 2048  ;;  %s1727_s24 = smov [#allocation8]  }
 0x2a4   : > { %p1582_p6 = scmp.ne.s32.totalorder %s2059_s30, %s1581_s12  ;;  %s1585_s0 = sshll.u32 %s1727_s24, 4  ;;  %s1586_s0 = int_to_ptr.vmem [resolvable:$false] %s1585_s0 }
 0x2a5   : > { %p2171_p9 = scmp.ne.s32.totalorder %s2169_s23, 0  ;;  %s1587_s20 = scalar_lea.vmem %s1586_s0, 4096 }
 0x2a6   : > { %p1588_p13 = scmp.lt.s32.totalorder %s2059_s30, %s1586_s0  ;;  %p1589_p8 = scmp.lt.s32.totalorder %s1587_s20, %s1581_s12 }
 0x2a7   : > { %s2064_s16 = scalar_lea.hbm %s2170_s9, %s1321_s6  ;;  %p1583_p5 = pnand %p1582_p6, %p2171_p9 }
 0x2a8   : > { %p1590_p10 = por %p1589_p8, %p1588_p13 }
 0x2a9   : > { %p1584_p12 = pneg %p1583_p5 }
 0x2ab   : > { %p1591_p0 = pnand %p1590_p10, %p1584_p12 }
 0x2ad   : > { %1594 = shalt.err (!%p1591_p0)
}
 0x2ae   : > { %s1595_s15 = scalar_lea.hbm %s2064_s16, 2048  ;;  %s1599_s14 = scalar_lea.hbm %s2170_s9, 8192 }
 0x2af   : > { %p1596_p11 = scmp.ne.s32.totalorder %s2064_s16, %s1595_s15  ;;  %p1600_p1 = scmp.lt.u32.totalorder %s2064_s16, %s2170_s9 }
 0x2b0   : > { %p1601_p7 = scmp.lt.u32.totalorder %s1599_s14, %s1595_s15  ;;  %p1603_p6 = scmp.lt.u32.totalorder %s1595_s15, %s2064_s16 }
 0x2b1   : > { %p1597_p2 = pnand %p1596_p11, %p2171_p9 }
 0x2b2   : > { %p1602_p3 = por %p1601_p7, %p1600_p1 }
 0x2b3   : > { %p1598_p4 = pneg %p1597_p2 }
 0x2b4   : > { %p1604_p5 = por %p1603_p6, %p1602_p3 }
 0x2b6   : > { %p1605_p12 = pnand %p1604_p5, %p1598_p4 }
 0x2b8   : > { %1608 = shalt.err (!%p1605_p12)
}
 0x2b9   : > { %s1728_s13 = smov 128   ;;  %s1729_s17 = smov 8  }
 0x2ba   : > { %1398 = dma.vmem_to_hbm [thread:$0]  (%p2171_p9), %s2059_s30, 2048, %s2064_s16, %s2068_s4, %s1728_s13, %s1728_s13, %s1729_s17  }
 0x2bb PF: > { %s2172_s12 = sld [smem:[#allocation11_spill]]  ;;  %p1409_p13 = scmp.ge.s32.totalorder %s1719_s28, 2 }
 0x2bc   : > { %p2173_p8 = scmp.ne.s32.totalorder %s2165_s29, 0 }
 0x2be   : > { %p1405_p10 = pnand %p1409_p13, %p2173_p8 }
 0x2c1   : > { %s1154_s24 = sand.u32 1, %s2172_s12  }
 0x2c2   : > { %s1155_s0 = scalar_lea.sflag [#allocation7], %s1154_s24 }
 0x2c3   : > { %1666 = dma.done.wait (!%p1405_p10), %s1155_s0, 2048  }
 0x2c4   : > { %1668 = vsyncadd (!%p1405_p10), %s1155_s0, 4294965248  ;;  %s21_s28 = sadd.s32 1, %s1719_s28   ;;  %s2175_s29 = sld [smem:[#allocation12_spill]] }
 0x2c5   : > { %p2097_p0 = scmp.ge.s32.totalorder %s21_s28, 10   ;;  %s2176_s30 = sld [smem:[#allocation13_spill]] }
 0x2c6   : > { %s2177_s16 = sld [smem:[#allocation14_spill]]  ;;  %s2179_s17 = smov %s1675_s18 }
 0x2c7   : > { %s2180_s18 = smov %s1679_s19  ;;  %s2181_s19 = smov %s1870_s8 }
 0x2c8   : > { %s2182_s20 = smov %s1687_s21  ;;  %s2183_s21 = smov %s1691_s22 }
 0x2c9   : > { %s2184_s22 = smov %s1875_s5  ;;  %s2185_s23 = smov %s1707_s25 }
 0x2ca   : > { %s2186_s24 = smov %s1711_s26  ;;  %s2187_s0 = smov %s1715_s27 }
 0x2cb   : > { %s2188_s25 = smov %s2175_s29  ;;  %s2189_s26 = smov %s2176_s30 }
 0x2cc   : > { %s2190_s27 = smov %s2177_s16  ;;  %20 = sbr.rel (!%p2097_p0) target bundleno = 14 (0xe), region = 98 }
 0x2d3   :  { %1160 = vsyncpa [#allocation6], 1 }
 0x2d4   :  { %1162 = vsyncpa [#allocation6 + $0x1], 1 }
 0x2d5   :  { %1163 = vsyncpa [#allocation7], 1 }
 0x2d6   :  { %1165 = vsyncpa [#allocation7 + $0x1], 1 }

</bundles_post_ra>
